<compile_context>
chip_gen: v7x
topology: tpu7x:2x2x1
jax: 0.10.0
libtpu: 0.0.40
codegen_flags: <defaults>
</compile_context>

<pallas_src>
import math
from functools import partial

import jax
import jax.numpy as jnp
from jax.experimental import pallas as pl
from jax.experimental.pallas import tpu as pltpu

VMEM_LIMIT = 48 * 1024 * 1024  # stay under v7x's 64 MiB physical VMEM


# ----------------------------- Pallas kernels ------------------------------

def _matmul_kernel(x_ref, w_ref, b_ref, o_ref, acc_ref, *, activation):
    """Tiled matmul with K-axis accumulation; bias (+ optional GELU) epilogue."""
    @pl.when(pl.program_id(2) == 0)
    def _():
        acc_ref[...] = jnp.zeros_like(acc_ref)

    acc_ref[...] += jnp.dot(x_ref[...], w_ref[...],
                            preferred_element_type=jnp.float32)

    @pl.when(pl.program_id(2) == pl.num_programs(2) - 1)
    def _():
        h = acc_ref[...] + b_ref[...].astype(jnp.float32)
        if activation == "gelu":
            # TODO(synk): HF BERT uses exact erf-GELU; tanh-approx GELU used here.
            h = jax.nn.gelu(h, approximate=True)
        o_ref[...] = h.astype(o_ref.dtype)


def _matmul_res_ln_kernel(x_ref, w_ref, b_ref, r_ref, g_ref, bb_ref,
                          o_ref, acc_ref, *, eps):
    """Tiled matmul (+bias) fused with residual add + LayerNorm epilogue.

    N (= hidden) is not tiled so the LN sees the full feature dim.
    """
    @pl.when(pl.program_id(1) == 0)
    def _():
        acc_ref[...] = jnp.zeros_like(acc_ref)

    acc_ref[...] += jnp.dot(x_ref[...], w_ref[...],
                            preferred_element_type=jnp.float32)

    @pl.when(pl.program_id(1) == pl.num_programs(1) - 1)
    def _():
        h = (acc_ref[...] + b_ref[...].astype(jnp.float32)
             + r_ref[...].astype(jnp.float32))
        mu = jnp.mean(h, axis=-1, keepdims=True)
        var = jnp.mean((h - mu) ** 2, axis=-1, keepdims=True)
        inv = jax.lax.rsqrt(var + eps)
        o_ref[...] = ((h - mu) * inv * g_ref[...].astype(jnp.float32)
                      + bb_ref[...].astype(jnp.float32)).astype(o_ref.dtype)


def _layernorm_kernel(x_ref, g_ref, b_ref, o_ref, *, eps):
    """LayerNorm (no residual) — f32 math regardless of I/O dtype."""
    h = x_ref[...].astype(jnp.float32)
    mu = jnp.mean(h, axis=-1, keepdims=True)
    var = jnp.mean((h - mu) ** 2, axis=-1, keepdims=True)
    inv = jax.lax.rsqrt(var + eps)
    o_ref[...] = ((h - mu) * inv * g_ref[...].astype(jnp.float32)
                  + b_ref[...].astype(jnp.float32)).astype(o_ref.dtype)


def _attention_kernel(qkv_ref, m_ref, o_ref, *, num_heads, scale):
    """Per-batch self-attention on a [S, 3H] QKV slab (H stays minor dim).

    Heads are unrolled statically; scores/softmax stay in f32, matmul inputs
    are bf16 with f32 accumulation.
    """
    S, H3 = qkv_ref.shape
    H = H3 // 3
    Dh = H // num_heads
    qkv = qkv_ref[...]
    neg = (1.0 - m_ref[0].astype(jnp.float32)) * (-1e9)   # [1, S]

    ctx_parts = []
    for h in range(num_heads):
        qh = qkv[:, h * Dh:(h + 1) * Dh]
        kh = qkv[:, H + h * Dh:H + (h + 1) * Dh]
        vh = qkv[:, 2 * H + h * Dh:2 * H + (h + 1) * Dh]
        s = jax.lax.dot_general(qh, kh, (((1,), (1,)), ((), ())),
                                preferred_element_type=jnp.float32) * scale
        s = s + neg                                         # broadcast [S,S]+[1,S]
        s_max = jnp.max(s, axis=-1, keepdims=True)
        p = jnp.exp(s - s_max)
        denom = jnp.sum(p, axis=-1, keepdims=True)
        p = p * pl.reciprocal(denom, approx=True)
        ctx_parts.append(jnp.dot(p.astype(vh.dtype), vh,
                                 preferred_element_type=jnp.float32))
    ctx = jnp.concatenate(ctx_parts, axis=-1)               # [S, H], lane-dense store
    o_ref[...] = ctx.astype(o_ref.dtype)


# ----------------------------- kernel wrappers ------------------------------

def _pick(dim, pref):
    """Tile = pref if it divides the dim, else the full dim (tiny demo shapes)."""
    return pref if (dim >= pref and dim % pref == 0) else dim


def pallas_linear(x, w, b, activation=None, out_dtype=jnp.bfloat16,
                  tm=256, tn=256, tk=512):
    M, K = x.shape
    N = w.shape[1]
    tm, tn, tk = _pick(M, tm), _pick(N, tn), _pick(K, tk)
    return pl.pallas_call(
        partial(_matmul_kernel, activation=activation),
        grid=(M // tm, N // tn, K // tk),
        out_shape=jax.ShapeDtypeStruct((M, N), out_dtype),
        in_specs=[pl.BlockSpec((tm, tk), lambda i, j, k: (i, k)),
                  pl.BlockSpec((tk, tn), lambda i, j, k: (k, j)),
                  pl.BlockSpec((1, tn), lambda i, j, k: (0, j))],
        out_specs=pl.BlockSpec((tm, tn), lambda i, j, k: (i, j)),
        scratch_shapes=[pltpu.VMEM((tm, tn), jnp.float32)],
        compiler_params=pltpu.CompilerParams(
            dimension_semantics=("parallel", "parallel", "arbitrary"),
            vmem_limit_bytes=VMEM_LIMIT),
    )(x, w, b.reshape(1, N))


def pallas_matmul_res_ln(x, w, b, res, gamma, beta, out_dtype=jnp.bfloat16,
                         tm=256, tk=512, eps=1e-12):
    M, K = x.shape
    N = w.shape[1]
    tm, tk = _pick(M, tm), _pick(K, tk)
    return pl.pallas_call(
        partial(_matmul_res_ln_kernel, eps=eps),
        grid=(M // tm, K // tk),
        out_shape=jax.ShapeDtypeStruct((M, N), out_dtype),
        in_specs=[pl.BlockSpec((tm, tk), lambda i, k: (i, k)),
                  pl.BlockSpec((tk, N), lambda i, k: (k, 0)),
                  pl.BlockSpec((1, N), lambda i, k: (0, 0)),
                  pl.BlockSpec((tm, N), lambda i, k: (i, 0)),
                  pl.BlockSpec((1, N), lambda i, k: (0, 0)),
                  pl.BlockSpec((1, N), lambda i, k: (0, 0))],
        out_specs=pl.BlockSpec((tm, N), lambda i, k: (i, 0)),
        scratch_shapes=[pltpu.VMEM((tm, N), jnp.float32)],
        compiler_params=pltpu.CompilerParams(
            dimension_semantics=("parallel", "arbitrary"),
            vmem_limit_bytes=VMEM_LIMIT),
    )(x, w, b.reshape(1, N), res, gamma.reshape(1, N), beta.reshape(1, N))


def pallas_layernorm(x, gamma, beta, out_dtype=jnp.bfloat16, tm=256, eps=1e-12):
    M, H = x.shape
    tm = _pick(M, tm)
    return pl.pallas_call(
        partial(_layernorm_kernel, eps=eps),
        grid=(M // tm,),
        out_shape=jax.ShapeDtypeStruct((M, H), out_dtype),
        in_specs=[pl.BlockSpec((tm, H), lambda i: (i, 0)),
                  pl.BlockSpec((1, H), lambda i: (0, 0)),
                  pl.BlockSpec((1, H), lambda i: (0, 0))],
        out_specs=pl.BlockSpec((tm, H), lambda i: (i, 0)),
        compiler_params=pltpu.CompilerParams(
            dimension_semantics=("parallel",),
            vmem_limit_bytes=VMEM_LIMIT),
    )(x, gamma.reshape(1, H), beta.reshape(1, H))


def pallas_attention(qkv, attention_mask, num_heads, seq_len):
    # qkv: [B*S, 3H] bf16; attention_mask: [B, S]
    M, H3 = qkv.shape
    H = H3 // 3
    S = seq_len
    B = M // S
    scale = 1.0 / math.sqrt(H // num_heads)
    mask3 = attention_mask.reshape(B, 1, S).astype(jnp.float32)
    return pl.pallas_call(
        partial(_attention_kernel, num_heads=num_heads, scale=scale),
        grid=(B,),
        out_shape=jax.ShapeDtypeStruct((M, H), qkv.dtype),
        in_specs=[pl.BlockSpec((S, H3), lambda b: (b, 0)),
                  pl.BlockSpec((1, 1, S), lambda b: (b, 0, 0))],
        out_specs=pl.BlockSpec((S, H), lambda b: (b, 0)),
        compiler_params=pltpu.CompilerParams(
            dimension_semantics=("parallel",),
            vmem_limit_bytes=VMEM_LIMIT),
    )(qkv, mask3)


# ------------------------- parameter initialization -------------------------

def init_params(key, cfg):
    H, I = cfg["hidden"], cfg["intermediate"]

    def dense(k, fi, fo):
        return (jax.random.normal(k, (fi, fo)) * 0.02).astype(jnp.bfloat16)

    keys = jax.random.split(key, 4 + cfg["num_layers"])
    params = {
        "word_emb": (jax.random.normal(keys[0], (cfg["vocab_size"], H)) * 0.02).astype(jnp.float32),
        "pos_emb": (jax.random.normal(keys[1], (cfg["max_position"], H)) * 0.02).astype(jnp.float32),
        "type_emb": (jax.random.normal(keys[2], (2, H)) * 0.02).astype(jnp.float32),
        "emb_ln_g": jnp.ones((H,), jnp.float32),
        "emb_ln_b": jnp.zeros((H,), jnp.float32),
        "cls_w": dense(keys[3], H, cfg["num_labels"]),
        "cls_b": jnp.zeros((cfg["num_labels"],), jnp.float32),
        "layers": [],
    }
    for l in range(cfg["num_layers"]):
        lk = jax.random.split(keys[4 + l], 6)
        wq, wk, wv = dense(lk[0], H, H), dense(lk[1], H, H), dense(lk[2], H, H)
        params["layers"].append({
            # fused QKV projection weight/bias
            "wqkv": jnp.concatenate([wq, wk, wv], axis=1),          # [H, 3H] bf16
            "bqkv": jnp.zeros((3 * H,), jnp.float32),
            "wo": dense(lk[3], H, H), "bo": jnp.zeros((H,), jnp.float32),
            "ln1_g": jnp.ones((H,), jnp.float32), "ln1_b": jnp.zeros((H,), jnp.float32),
            "w1": dense(lk[4], H, I), "b1": jnp.zeros((I,), jnp.float32),
            "w2": dense(lk[5], I, H), "b2": jnp.zeros((H,), jnp.float32),
            "ln2_g": jnp.ones((H,), jnp.float32), "ln2_b": jnp.zeros((H,), jnp.float32),
        })
    return params


# --------------------------------- forward ----------------------------------

def torch_model_forward(params, input_ids, attention_mask, cfg, target=None):
    """Mirrors TorchModel.forward: logits if target is None, else CE loss."""
    B, S = input_ids.shape
    H = cfg["hidden"]
    nH = cfg["num_heads"]

    # Embedding gathers are glue (XLA); LayerNorm is a Pallas kernel.
    # TODO(synk): token_type_ids assumed all-zero (segment 0 only).
    emb = (params["word_emb"][input_ids]
           + params["pos_emb"][:S][None, :, :]
           + params["type_emb"][0][None, None, :])                 # f32 [B,S,H]
    x = pallas_layernorm(emb.reshape(B * S, H),
                         params["emb_ln_g"], params["emb_ln_b"])   # bf16 [B*S,H]

    for layer in params["layers"]:
        qkv = pallas_linear(x, layer["wqkv"], layer["bqkv"])        # [B*S, 3H]
        ctx = pallas_attention(qkv, attention_mask, nH, S)          # [B*S, H]
        x = pallas_matmul_res_ln(ctx, layer["wo"], layer["bo"], x,
                                 layer["ln1_g"], layer["ln1_b"])    # proj+res+LN1
        ffn = pallas_linear(x, layer["w1"], layer["b1"], activation="gelu")
        x = pallas_matmul_res_ln(ffn, layer["w2"], layer["b2"], x,
                                 layer["ln2_g"], layer["ln2_b"])    # ffn2+res+LN2

    # Token-classification head (dropout is a no-op in eval).
    # Pad output dim to 128 lanes for unmasked stores; slice back afterwards.
    NL = cfg["num_labels"]
    NLp = ((NL + 127) // 128) * 128
    cls_w = jnp.zeros((H, NLp), jnp.bfloat16).at[:, :NL].set(params["cls_w"])
    cls_b = jnp.zeros((NLp,), jnp.float32).at[:NL].set(params["cls_b"])
    logits = pallas_linear(x, cls_w, cls_b, out_dtype=jnp.float32)[:, :NL]
    logits = logits.reshape(B, S, NL)

    if target is None:
        return logits
    # TODO(synk): HF CrossEntropyLoss ignore_index=-100 not modeled.
    logp = jax.nn.log_softmax(logits, axis=-1)
    nll = -jnp.take_along_axis(logp, target[..., None], axis=-1)[..., 0]
    return jnp.mean(nll)


# ----------------------------------- main ------------------------------------

if __name__ == "__main__":
    cfg = dict(vocab_size=128, hidden=32, num_heads=2, intermediate=64,
               num_layers=2, max_position=64, num_labels=4)
    B, S = 2, 8

    key = jax.random.PRNGKey(0)
    k_params, k_ids = jax.random.split(key)
    params = init_params(k_params, cfg)

    input_ids = jax.random.randint(k_ids, (B, S), 0, cfg["vocab_size"], dtype=jnp.int32)
    attention_mask = jnp.array([[1, 1, 1, 1, 1, 1, 0, 0],
                                [1, 1, 1, 1, 1, 1, 1, 1]], dtype=jnp.int32)

    logits = torch_model_forward(params, input_ids, attention_mask, cfg, target=None)
    logits = jax.block_until_ready(logits)
    assert logits.shape == (B, S, cfg["num_labels"])
    assert bool(jnp.all(jnp.isfinite(logits)))
    print("KERNEL_OK")
</pallas_src>

<mosaic_0001>
module attributes {stable_mosaic.version = 11 : i64} {
  func.func @_layernorm_kernel(%arg0: i32, %arg1: memref<16x32xf32, #tpu.memory_space<vmem>>, %arg2: memref<1x32xf32, #tpu.memory_space<vmem>>, %arg3: memref<1x32xf32, #tpu.memory_space<vmem>>, %arg4: memref<16x32xbf16, #tpu.memory_space<vmem>>) attributes {dimension_semantics = [#tpu.dimension_semantics<parallel>], iteration_bounds = array<i64: 1>, scalar_prefetch = 0 : i64, scratch_operands = 0 : i64, tpu.core_type = #tpu.core_type<tc>, window_params = [{transform_indices = @transform_0, window_bounds = array<i64: 16, 32>}, {pipeline_mode = #tpu.pipeline_mode<synchronous>, transform_indices = @transform_1, window_bounds = array<i64: 1, 32>}, {pipeline_mode = #tpu.pipeline_mode<synchronous>, transform_indices = @transform_2, window_bounds = array<i64: 1, 32>}, {transform_indices = @transform_3, window_bounds = array<i64: 16, 32>}]} {
    %c0 = arith.constant 0 : index
    %c0_0 = arith.constant 0 : index
    %0 = vector.load %arg1[%c0, %c0_0] : memref<16x32xf32, #tpu.memory_space<vmem>>, vector<16x32xf32>
    %cst = arith.constant dense<0.000000e+00> : vector<16xf32>
    %1 = vector.multi_reduction <add>, %0, %cst [1] : vector<16x32xf32> to vector<16xf32>
    %2 = vector.shape_cast %1 : vector<16xf32> to vector<16x1xf32>
    %cst_1 = arith.constant 3.200000e+01 : f32
    %3 = vector.broadcast %cst_1 : f32 to vector<16x1xf32>
    %4 = arith.divf %2, %3 : vector<16x1xf32>
    %5 = vector.broadcast %4 : vector<16x1xf32> to vector<16x32xf32>
    %6 = arith.subf %0, %5 : vector<16x32xf32>
    %7 = arith.mulf %6, %6 : vector<16x32xf32>
    %cst_2 = arith.constant dense<0.000000e+00> : vector<16xf32>
    %8 = vector.multi_reduction <add>, %7, %cst_2 [1] : vector<16x32xf32> to vector<16xf32>
    %9 = vector.shape_cast %8 : vector<16xf32> to vector<16x1xf32>
    %cst_3 = arith.constant 3.200000e+01 : f32
    %10 = vector.broadcast %cst_3 : f32 to vector<16x1xf32>
    %11 = arith.divf %9, %10 : vector<16x1xf32>
    %cst_4 = arith.constant 9.99999996E-13 : f32
    %12 = vector.broadcast %cst_4 : f32 to vector<16x1xf32>
    %13 = arith.addf %11, %12 : vector<16x1xf32>
    %14 = math.rsqrt %13 : vector<16x1xf32>
    %15 = vector.broadcast %4 : vector<16x1xf32> to vector<16x32xf32>
    %16 = arith.subf %0, %15 : vector<16x32xf32>
    %17 = vector.broadcast %14 : vector<16x1xf32> to vector<16x32xf32>
    %18 = arith.mulf %16, %17 : vector<16x32xf32>
    %c0_5 = arith.constant 0 : index
    %c0_6 = arith.constant 0 : index
    %19 = vector.load %arg2[%c0_5, %c0_6] : memref<1x32xf32, #tpu.memory_space<vmem>>, vector<1x32xf32>
    %20 = vector.broadcast %19 : vector<1x32xf32> to vector<16x32xf32>
    %21 = arith.mulf %18, %20 : vector<16x32xf32>
    %c0_7 = arith.constant 0 : index
    %c0_8 = arith.constant 0 : index
    %22 = vector.load %arg3[%c0_7, %c0_8] : memref<1x32xf32, #tpu.memory_space<vmem>>, vector<1x32xf32>
    %23 = vector.broadcast %22 : vector<1x32xf32> to vector<16x32xf32>
    %24 = arith.addf %21, %23 : vector<16x32xf32>
    %25 = arith.truncf %24 : vector<16x32xf32> to vector<16x32xbf16>
    %c0_9 = arith.constant 0 : index
    %c0_10 = arith.constant 0 : index
    %26 = vector.load %arg4[%c0_9, %c0_10] : memref<16x32xbf16, #tpu.memory_space<vmem>>, vector<16x32xbf16>
    tpu.vector_store %arg4[%c0_9, %c0_10], %25 {strides = array<i32>} : memref<16x32xbf16, #tpu.memory_space<vmem>>, vector<16x32xbf16>,
    return
  }
  func.func @transform_0(%arg0: i32) -> (i32, i32) {
    %c0_i32 = arith.constant 0 : i32
    %c0_i32_0 = arith.constant 0 : i32
    return %arg0, %c0_i32 : i32, i32
  }
  func.func @transform_1(%arg0: i32) -> (i32, i32) {
    %c0_i32 = arith.constant 0 : i32
    %c0_i32_0 = arith.constant 0 : i32
    %c0_i32_1 = arith.constant 0 : i32
    return %c0_i32, %c0_i32_0 : i32, i32
  }
  func.func @transform_2(%arg0: i32) -> (i32, i32) {
    %c0_i32 = arith.constant 0 : i32
    %c0_i32_0 = arith.constant 0 : i32
    %c0_i32_1 = arith.constant 0 : i32
    return %c0_i32, %c0_i32_0 : i32, i32
  }
  func.func @transform_3(%arg0: i32) -> (i32, i32) {
    %c0_i32 = arith.constant 0 : i32
    %c0_i32_0 = arith.constant 0 : i32
    return %arg0, %c0_i32 : i32, i32
  }
}

</mosaic_0001>

<bundles_post_ra>
// kernel: tpu_custom_call.1
= control target key start
LH: loop header
LB: loop body
LE: loop exit
PB: predicated region body
PF: predicated region fallthrough
CT: control target
= control target key end

     0   :  { %8 = vsyncpa [#allocation3], 0  ;;  %s229_s0 = inlined_call_operand.hbm [shape: f32[16,32], index: 0, kind: input, shape index: {}]   ;;  %s230_s1 = inlined_call_operand.vmem [shape: f32[1,32], index: 1, kind: input, shape index: {}]   ;;  %s231_s2 = inlined_call_operand.vmem [shape: f32[1,32], index: 2, kind: input, shape index: {}]   ;;  %s232_s3 = inlined_call_operand.hbm [shape: bf16[16,32], index: 3, kind: output, shape index: {}]  }
   0x1   :  { %9 = vsyncpa [#allocation4], 0  ;;  %s169_s12 = smov [#allocation2]   ;;  %s121_s16 = scalar_lea.hbm %s229_s0, 256 }
   0x2   :  { %s15_s13 = sshll.u32 %s169_s12, 4  ;;  %p122_p0 = scmp.ne.s32.totalorder %s229_s0, %s121_s16  ;;  %s16_s13 = int_to_ptr.vmem [resolvable:$true] %s15_s13 }
   0x3   :  { %p125_p1 = scmp.lt.u32.totalorder %s121_s16, %s229_s0 }
   0x5   :  { %p127_p2 = pnand %p125_p1, %p122_p0 }
   0x7   :  { %130 = shalt.err (!%p127_p2)
}
   0x8   :  { %s131_s21 = scalar_lea.vmem %s16_s13, 256  ;;  %p136_p4 = scmp.lt.s32.totalorder %s16_s13, %s16_s13 }
   0x9   :  { %p132_p3 = scmp.ne.s32.totalorder %s16_s13, %s131_s21  ;;  %p137_p5 = scmp.lt.s32.totalorder %s131_s21, %s131_s21 }
   0xb   :  { %p138_p6 = por %p137_p5, %p136_p4 }
   0xd   :  { %p139_p7 = pnand %p138_p6, %p132_p3 }
   0xf   :  { %142 = shalt.err (!%p139_p7)
}
  0x10   :  { %s170_s22 = smov 128   ;;  %s171_s23 = smov 8  }
  0x11   :  { %21 = dma.hbm_to_vmem [thread:$0]  %s229_s0, 256, %s16_s13, [#allocation3], %s170_s22, %s170_s22, %s171_s23  }
  0x12   :  { %165 = dma.done.wait [#allocation3], 256  }
  0x13   :  { %166 = vsyncadd [#allocation3], 4294967040  ;;  %vm31_vm0 = vcmask 261120   ;;  %v29_v0 = vld [vmem:[#allocation2] sm:$0xff]  ;;  %v30_v1 = vld [vmem:[#allocation2 + $0x8] sm:$0xff]  ;;  %vm85_vm1 = vcmask 257024  }
  0x14   :  { %v32_v2 = vsel %vm31_vm0, %v29_v0, 0.0  ;;  %v35_v3 = vsel %vm31_vm0, %v30_v1, 0.0  ;;  %v105_v21 = vld [vmem:[%s230_s1] ss:$0 sm:$0xff]  ;;  %s172_s29 = smov [#allocation5]  }
  0x15   :  { %33 = vadd.xlane.f32.xlu0 %v32_v2  ;;  %v106_v23 = vld [vmem:[%s231_s2] ss:$0 sm:$0xff]  ;;  %s93_s30 = sshll.u32 %s172_s29, 4  ;;  %s94_s30 = int_to_ptr.vmem [resolvable:$true] %s93_s30 }
  0x16   :  { %s143_s1 = scalar_lea.vmem %s94_s30, 128  ;;  %p148_p9 = scmp.lt.s32.totalorder %s94_s30, %s94_s30 }
  0x17   :  { %p144_p8 = scmp.ne.s32.totalorder %s94_s30, %s143_s1  ;;  %p149_p10 = scmp.lt.s32.totalorder %s143_s1, %s143_s1 }
  0x19   :  { %36 = vadd.xlane.f32.xlu0 %v35_v3  ;;  %p150_p11 = por %p149_p10, %p148_p9 }
  0x1b   :  { %p151_p12 = pnand %p150_p11, %p144_p8 }
  0xa2   :  { %v34_v4 = vpop.xlane.xlu0 %33 }
  0xa3   :  { %v39_v5 = vmul.f32 0.03125, %v34_v4 }
  0xa5   :  { %v41_v6 = vsub.f32 %v29_v0, %v39_v5 }
  0xa6   :  { %v37_v7 = vpop.xlane.xlu0 %36 }
  0xa7   :  { %v40_v8 = vmul.f32 0.03125, %v37_v7  ;;  %v43_v9 = vmul.f32 %v41_v6, %v41_v6 }
  0xa9   :  { %v42_v10 = vsub.f32 %v30_v1, %v40_v8  ;;  %v45_v11 = vsel %vm31_vm0, %v43_v9, 0.0 }
  0xaa   :  { %46 = vadd.xlane.f32.xlu1 %v45_v11 }
  0xab   :  { %v44_v12 = vmul.f32 %v42_v10, %v42_v10 }
  0xad   :  { %v48_v13 = vsel %vm31_vm0, %v44_v12, 0.0 }
  0xae   :  { %49 = vadd.xlane.f32.xlu1 %v48_v13 }
 0x137   :  { %v47_v14 = vpop.xlane.xlu1 %46 }
 0x138   :  { %v51_v15 = vmul.f32 0.03125, %v47_v14 }
 0x13a   :  { %v53_v16 = vadd.f32 1e-12, %v51_v15 }
 0x13b   :  { %v50_v17 = vpop.xlane.xlu1 %49 }
 0x13c   :  { %117 = vrsqrt.f32 %v53_v16  ;;  %v52_v18 = vmul.f32 0.03125, %v50_v17 }
 0x13e   :  { %v54_v19 = vadd.f32 1e-12, %v52_v18 }
 0x140   :  { %119 = vrsqrt.f32 %v54_v19 }
 0x146   :  { %v118_v20 = vpop.eup %117 }
 0x147   :  { %v57_v22 = vmul.f32 %v118_v20, %v41_v6 }
 0x149   :  { %v66_v24 = vmul.f32 %v105_v21, %v57_v22 }
 0x14a   :  { %v120_v25 = vpop.eup %119 }
 0x14b   :  { %v58_v26 = vmul.f32 %v120_v25, %v42_v10  ;;  %v75_v27 = vadd.f32 %v106_v23, %v66_v24 }
 0x14d   :  { %v67_v28 = vmul.f32 %v105_v21, %v58_v26  ;;  %v109_v29 = vpack.c.bf16 %v75_v27, %v75_v27 }
 0x14f   :  { %v76_v30 = vadd.f32 %v106_v23, %v67_v28  ;;  %86 = vst.msk [vmem:[#allocation5] sm:$0xf] %vm85_vm1, %v109_v29 }
 0x151   :  { %v110_v31 = vpack.c.bf16 %v76_v30, %v76_v30 }
 0x153   :  { %87 = vst.msk [vmem:[#allocation5 + $0x4] sm:$0xf] %vm85_vm1, %v110_v31 }
 0x154   :  { %154 = shalt.err (!%p151_p12)
}
 0x155   :  { %s155_s5 = scalar_lea.hbm %s232_s3, 128 }
 0x156   :  { %p156_p13 = scmp.ne.s32.totalorder %s232_s3, %s155_s5  ;;  %p159_p0 = scmp.lt.u32.totalorder %s155_s5, %s232_s3 }
 0x158   :  { %p161_p1 = pnand %p159_p0, %p156_p13 }
 0x15a   :  { %164 = shalt.err (!%p161_p1)
}
 0x15b   :  { %s173_s10 = smov 64   ;;  %s174_s11 = smov 4  }
 0x15c   :  { %99 = dma.vmem_to_hbm [thread:$0]  %s94_s30, 128, %s232_s3, [#allocation4], %s173_s10, %s173_s10, %s174_s11  }
 0x15d   :  { %167 = dma.done.wait [#allocation4], 128  }
 0x15e   :  { %168 = vsyncadd [#allocation4], 4294967168 }
 0x15f   :  { %103 = vsyncpa [#allocation3], 1 }
 0x160   :  { %104 = vsyncpa [#allocation4], 1 }

</bundles_post_ra>
